<compile_context>
chip_gen: v7x
topology: tpu7x:2x2x1
jax: 0.10.0
libtpu: 0.0.40
codegen_flags: <defaults>
</compile_context>

<pallas_src>
import jax
import jax.numpy as jnp
from jax.experimental import pallas as pl
from jax.experimental.pallas import tpu as pltpu


def vae_kernel(x_ref, eps_ref,
               w1_ref, b1_ref, w2_ref, b2_ref,
               wml_ref, bml_ref,
               wd1_ref, bd1_ref, wd2_ref, bd2_ref, wd3_ref, bd3_ref,
               xrec_ref, mulv_ref):
    f32, bf16 = jnp.float32, jnp.bfloat16
    lp = eps_ref.shape[-1]  # latent padded to a multiple of 128

    x = x_ref[...]  # bf16 (cast in the wrapper)

    # ---- encoder: Linear + ReLU, Linear + ReLU (bf16 matmul, f32 accumulate) ----
    h = jnp.dot(x, w1_ref[...], preferred_element_type=f32) + b1_ref[...]
    h = jnp.maximum(h, 0.0)                                   # f32 elementwise
    h = jnp.dot(h.astype(bf16), w2_ref[...], preferred_element_type=f32) + b2_ref[...]
    h = jnp.maximum(h, 0.0)

    # ---- fused latent heads: [mu | logvar], each half 128-lane aligned ----
    ml = jnp.dot(h.astype(bf16), wml_ref[...], preferred_element_type=f32) + bml_ref[...]
    mu = ml[:, :lp]        # vreg-boundary slice (no masking)
    logvar = ml[:, lp:]

    # ---- reparameterization: z = mu + eps * exp(0.5 * logvar) (f32/EUP) ----
    z = mu + eps_ref[...] * jnp.exp(0.5 * logvar)

    # ---- decoder: Linear + ReLU, Linear + ReLU, Linear + Sigmoid ----
    d = jnp.dot(z.astype(bf16), wd1_ref[...], preferred_element_type=f32) + bd1_ref[...]
    d = jnp.maximum(d, 0.0)
    d = jnp.dot(d.astype(bf16), wd2_ref[...], preferred_element_type=f32) + bd2_ref[...]
    d = jnp.maximum(d, 0.0)
    logits = jnp.dot(d.astype(bf16), wd3_ref[...], preferred_element_type=f32) + bd3_ref[...]

    xrec_ref[...] = jax.nn.sigmoid(logits).astype(xrec_ref.dtype)  # lane-dense store
    mulv_ref[...] = ml                                             # lane-dense store


def vae_forward(x, eps, params, *, tile_b=None, out_dtype=jnp.float32):
    """x: (B, input_size) f32, eps: (B, latent) f32.

    Returns (x_recon (out_dtype), mu (f32), logvar (f32)).
    """
    B, input_size = x.shape
    latent = eps.shape[1]
    hidden = params["w1"].shape[1]

    f32, bf16 = jnp.float32, jnp.bfloat16

    # Latent padded to a 128-lane boundary for vreg-aligned mu/logvar slices
    # and a full-K first decoder matmul.
    lp = 128 * pl.cdiv(latent, 128)
    pad_l = lp - latent

    # Batch tile: fill the MXU M dim; keep multiples of 16 for bf16 packing;
    # >=2 grid steps for large B so v7x's second TensorCore gets work.
    if tile_b is None:
        if B >= 512:
            tile_b = 256
        elif B > 16:
            tile_b = 16 * pl.cdiv(min(B, 256), 16)
        else:
            tile_b = B
    Bp = tile_b * pl.cdiv(B, tile_b)       # pad batch to a tile multiple
    grid = (Bp // tile_b,)

    # ---- activations (bf16 matmul inputs, f32 eps), zero-padded ----
    xb = x.astype(bf16)
    epsf = eps.astype(f32)
    if Bp != B:
        xb = jnp.pad(xb, ((0, Bp - B), (0, 0)))
        epsf = jnp.pad(epsf, ((0, Bp - B), (0, 0)))
    if pad_l:
        epsf = jnp.pad(epsf, ((0, 0), (0, pad_l)))

    # ---- fused, lane-padded [mu | logvar] head + zero-row-padded wd1 ----
    zcol = jnp.zeros((hidden, pad_l), f32)
    zrow = jnp.zeros((1, pad_l), f32)
    wml = jnp.concatenate([params["wmu"], zcol, params["wlv"], zcol], axis=1)
    bml = jnp.concatenate([params["bmu"], zrow, params["blv"], zrow], axis=1)
    wd1 = jnp.concatenate([params["wd1"], jnp.zeros((pad_l, hidden), f32)], axis=0)

    args = [xb, epsf,
            params["w1"].astype(bf16), params["b1"].astype(f32),
            params["w2"].astype(bf16), params["b2"].astype(f32),
            wml.astype(bf16), bml.astype(f32),
            wd1.astype(bf16), params["bd1"].astype(f32),
            params["wd2"].astype(bf16), params["bd2"].astype(f32),
            params["wd3"].astype(bf16), params["bd3"].astype(f32)]

    row = lambda i: (i, 0)      # batch-tiled arrays
    const = lambda i: (0, 0)    # weights/biases: resident across batch tiles
    # Constant-index weights never need the second pipeline buffer.
    wspec = lambda a: pl.BlockSpec(a.shape, const, pipeline_mode=pl.Buffered(1))

    in_specs = [pl.BlockSpec((tile_b, input_size), row),
                pl.BlockSpec((tile_b, lp), row)]
    in_specs += [wspec(a) for a in args[2:]]

    out_shapes = (jax.ShapeDtypeStruct((Bp, input_size), out_dtype),   # x_recon
                  jax.ShapeDtypeStruct((Bp, 2 * lp), jnp.float32))     # [mu | logvar]
    out_specs = (pl.BlockSpec((tile_b, input_size), row),
                 pl.BlockSpec((tile_b, 2 * lp), row))

    flops = 2 * Bp * (input_size * hidden + hidden * hidden + hidden * 2 * lp
                      + lp * hidden + hidden * hidden + hidden * input_size)
    transcendentals = Bp * (lp + input_size)            # exp (std) + sigmoid
    bytes_acc = (sum(int(a.size) * a.dtype.itemsize for a in args)
                 + Bp * input_size * jnp.dtype(out_dtype).itemsize
                 + Bp * 2 * lp * 4)

    xrec, mulv = pl.pallas_call(
        vae_kernel,
        out_shape=out_shapes,
        grid=grid,
        in_specs=in_specs,
        out_specs=out_specs,
        compiler_params=pltpu.CompilerParams(dimension_semantics=("parallel",)),
        cost_estimate=pl.CostEstimate(flops=flops,
                                      transcendentals=transcendentals,
                                      bytes_accessed=bytes_acc),
    )(*args)

    # Strip batch padding and latent padding in the wrapper (pure views).
    return xrec[:B], mulv[:B, :latent], mulv[:B, lp:lp + latent]


def init_linear(key, in_f, out_f):
    """PyTorch-style uniform init, returned already transposed to (in, out)."""
    kw, kb = jax.random.split(key)
    bound = 1.0 / (float(in_f) ** 0.5)
    wt = jax.random.uniform(kw, (in_f, out_f), jnp.float32, -bound, bound)
    bs = jax.random.uniform(kb, (1, out_f), jnp.float32, -bound, bound)
    return wt, bs


def init_vae_params(key, input_size, hidden_size, latent_size):
    ks = jax.random.split(key, 7)
    p = {}
    p["w1"], p["b1"] = init_linear(ks[0], input_size, hidden_size)
    p["w2"], p["b2"] = init_linear(ks[1], hidden_size, hidden_size)
    p["wmu"], p["bmu"] = init_linear(ks[2], hidden_size, latent_size)
    p["wlv"], p["blv"] = init_linear(ks[3], hidden_size, latent_size)
    p["wd1"], p["bd1"] = init_linear(ks[4], latent_size, hidden_size)
    p["wd2"], p["bd2"] = init_linear(ks[5], hidden_size, hidden_size)
    p["wd3"], p["bd3"] = init_linear(ks[6], hidden_size, input_size)
    return p


if __name__ == "__main__":
    # Small demo shapes: 256-wide layers fill the v6e/v7x MXU; latent=20 matches
    # the module's default latent and exercises the pad-to-128 path.
    batch = 8
    input_size = 256
    hidden_size = 256
    latent_size = 20

    root = jax.random.PRNGKey(0)
    k_params, k_x, k_eps = jax.random.split(root, 3)

    params = init_vae_params(k_params, input_size, hidden_size, latent_size)
    x = jax.random.uniform(k_x, (batch, input_size), jnp.float32)      # pixel-like in [0,1)
    eps = jax.random.normal(k_eps, (batch, latent_size), jnp.float32)  # eps ~ N(0, I)

    x_recon, mu, logvar = vae_forward(x, eps, params)
    jax.block_until_ready((x_recon, mu, logvar))

    # Pure-JAX reference with the SAME bf16-in / f32-accumulate dtype plan.
    # (Note: bf16 weights differ from a pure-f32 PyTorch VAE by ~1e-2.)
    def ref(x, eps, p):
        bf16, f32 = jnp.bfloat16, jnp.float32
        mm = lambda a, w: jnp.dot(a.astype(bf16), w.astype(bf16),
                                  preferred_element_type=f32)
        h = jnp.maximum(mm(x, p["w1"]) + p["b1"], 0.0)
        h = jnp.maximum(mm(h, p["w2"]) + p["b2"], 0.0)
        mu_r = mm(h, p["wmu"]) + p["bmu"]
        lv_r = mm(h, p["wlv"]) + p["blv"]
        z = mu_r + eps * jnp.exp(0.5 * lv_r)
        d = jnp.maximum(mm(z, p["wd1"]) + p["bd1"], 0.0)
        d = jnp.maximum(mm(d, p["wd2"]) + p["bd2"], 0.0)
        return jax.nn.sigmoid(mm(d, p["wd3"]) + p["bd3"]), mu_r, lv_r

    xr_r, mu_r, lv_r = ref(x, eps, params)
    assert x_recon.shape == (batch, input_size)
    assert mu.shape == (batch, latent_size) and logvar.shape == (batch, latent_size)
    assert jnp.allclose(x_recon, xr_r, atol=2e-2, rtol=2e-2)
    assert jnp.allclose(mu, mu_r, atol=2e-2, rtol=2e-2)
    assert jnp.allclose(logvar, lv_r, atol=2e-2, rtol=2e-2)

    print("KERNEL_OK")
</pallas_src>

<mosaic_0001>
module attributes {stable_mosaic.version = 11 : i64} {
  func.func @vae_kernel(%arg0: i32, %arg1: memref<8x256xbf16, #tpu.memory_space<vmem>>, %arg2: memref<8x128xf32, #tpu.memory_space<vmem>>, %arg3: memref<256x256xbf16, #tpu.memory_space<vmem>>, %arg4: memref<1x256xf32, #tpu.memory_space<vmem>>, %arg5: memref<256x256xbf16, #tpu.memory_space<vmem>>, %arg6: memref<1x256xf32, #tpu.memory_space<vmem>>, %arg7: memref<256x256xbf16, #tpu.memory_space<vmem>>, %arg8: memref<1x256xf32, #tpu.memory_space<vmem>>, %arg9: memref<128x256xbf16, #tpu.memory_space<vmem>>, %arg10: memref<1x256xf32, #tpu.memory_space<vmem>>, %arg11: memref<256x256xbf16, #tpu.memory_space<vmem>>, %arg12: memref<1x256xf32, #tpu.memory_space<vmem>>, %arg13: memref<256x256xbf16, #tpu.memory_space<vmem>>, %arg14: memref<1x256xf32, #tpu.memory_space<vmem>>, %arg15: memref<8x256xf32, #tpu.memory_space<vmem>>, %arg16: memref<8x256xf32, #tpu.memory_space<vmem>>) attributes {dimension_semantics = [#tpu.dimension_semantics<parallel>], iteration_bounds = array<i64: 1>, scalar_prefetch = 0 : i64, scratch_operands = 0 : i64, tpu.core_type = #tpu.core_type<tc>, window_params = [{transform_indices = @transform_0, window_bounds = array<i64: 8, 256>}, {transform_indices = @transform_1, window_bounds = array<i64: 8, 128>}, {pipeline_mode = #tpu.pipeline_mode<synchronous>, transform_indices = @transform_2, window_bounds = array<i64: 256, 256>}, {pipeline_mode = #tpu.pipeline_mode<synchronous>, transform_indices = @transform_3, window_bounds = array<i64: 1, 256>}, {pipeline_mode = #tpu.pipeline_mode<synchronous>, transform_indices = @transform_4, window_bounds = array<i64: 256, 256>}, {pipeline_mode = #tpu.pipeline_mode<synchronous>, transform_indices = @transform_5, window_bounds = array<i64: 1, 256>}, {pipeline_mode = #tpu.pipeline_mode<synchronous>, transform_indices = @transform_6, window_bounds = array<i64: 256, 256>}, {pipeline_mode = #tpu.pipeline_mode<synchronous>, transform_indices = @transform_7, window_bounds = array<i64: 1, 256>}, {pipeline_mode = #tpu.pipeline_mode<synchronous>, transform_indices = @transform_8, window_bounds = array<i64: 128, 256>}, {pipeline_mode = #tpu.pipeline_mode<synchronous>, transform_indices = @transform_9, window_bounds = array<i64: 1, 256>}, {pipeline_mode = #tpu.pipeline_mode<synchronous>, transform_indices = @transform_10, window_bounds = array<i64: 256, 256>}, {pipeline_mode = #tpu.pipeline_mode<synchronous>, transform_indices = @transform_11, window_bounds = array<i64: 1, 256>}, {pipeline_mode = #tpu.pipeline_mode<synchronous>, transform_indices = @transform_12, window_bounds = array<i64: 256, 256>}, {pipeline_mode = #tpu.pipeline_mode<synchronous>, transform_indices = @transform_13, window_bounds = array<i64: 1, 256>}, {transform_indices = @transform_14, window_bounds = array<i64: 8, 256>}, {transform_indices = @transform_15, window_bounds = array<i64: 8, 256>}]} {
    %c0 = arith.constant 0 : index
    %c0_0 = arith.constant 0 : index
    %0 = vector.load %arg1[%c0, %c0_0] : memref<8x256xbf16, #tpu.memory_space<vmem>>, vector<8x256xbf16>
    %c0_1 = arith.constant 0 : index
    %c0_2 = arith.constant 0 : index
    %1 = vector.load %arg3[%c0_1, %c0_2] : memref<256x256xbf16, #tpu.memory_space<vmem>>, vector<256x256xbf16>
    %cst = arith.constant dense<0.000000e+00> : vector<8x256xf32>
    %2 = tpu.matmul %0, %1, %cst {dimension_numbers = #tpu.dot_dimension_numbers<[1], [0], [0], [1], [0, 0, 1, 1], [], []>} : vector<8x256xbf16>, vector<256x256xbf16>, vector<8x256xf32> -> vector<8x256xf32>
    %c0_3 = arith.constant 0 : index
    %c0_4 = arith.constant 0 : index
    %3 = vector.load %arg4[%c0_3, %c0_4] : memref<1x256xf32, #tpu.memory_space<vmem>>, vector<1x256xf32>
    %4 = vector.broadcast %3 : vector<1x256xf32> to vector<8x256xf32>
    %5 = arith.addf %2, %4 : vector<8x256xf32>
    %cst_5 = arith.constant 0.000000e+00 : f32
    %6 = vector.broadcast %cst_5 : f32 to vector<8x256xf32>
    %7 = arith.maximumf %5, %6 : vector<8x256xf32>
    %8 = arith.truncf %7 : vector<8x256xf32> to vector<8x256xbf16>
    %c0_6 = arith.constant 0 : index
    %c0_7 = arith.constant 0 : index
    %9 = vector.load %arg5[%c0_6, %c0_7] : memref<256x256xbf16, #tpu.memory_space<vmem>>, vector<256x256xbf16>
    %cst_8 = arith.constant dense<0.000000e+00> : vector<8x256xf32>
    %10 = tpu.matmul %8, %9, %cst_8 {dimension_numbers = #tpu.dot_dimension_numbers<[1], [0], [0], [1], [0, 0, 1, 1], [], []>} : vector<8x256xbf16>, vector<256x256xbf16>, vector<8x256xf32> -> vector<8x256xf32>
    %c0_9 = arith.constant 0 : index
    %c0_10 = arith.constant 0 : index
    %11 = vector.load %arg6[%c0_9, %c0_10] : memref<1x256xf32, #tpu.memory_space<vmem>>, vector<1x256xf32>
    %12 = vector.broadcast %11 : vector<1x256xf32> to vector<8x256xf32>
    %13 = arith.addf %10, %12 : vector<8x256xf32>
    %cst_11 = arith.constant 0.000000e+00 : f32
    %14 = vector.broadcast %cst_11 : f32 to vector<8x256xf32>
    %15 = arith.maximumf %13, %14 : vector<8x256xf32>
    %16 = arith.truncf %15 : vector<8x256xf32> to vector<8x256xbf16>
    %c0_12 = arith.constant 0 : index
    %c0_13 = arith.constant 0 : index
    %17 = vector.load %arg7[%c0_12, %c0_13] : memref<256x256xbf16, #tpu.memory_space<vmem>>, vector<256x256xbf16>
    %cst_14 = arith.constant dense<0.000000e+00> : vector<8x256xf32>
    %18 = tpu.matmul %16, %17, %cst_14 {dimension_numbers = #tpu.dot_dimension_numbers<[1], [0], [0], [1], [0, 0, 1, 1], [], []>} : vector<8x256xbf16>, vector<256x256xbf16>, vector<8x256xf32> -> vector<8x256xf32>
    %c0_15 = arith.constant 0 : index
    %c0_16 = arith.constant 0 : index
    %19 = vector.load %arg8[%c0_15, %c0_16] : memref<1x256xf32, #tpu.memory_space<vmem>>, vector<1x256xf32>
    %20 = vector.broadcast %19 : vector<1x256xf32> to vector<8x256xf32>
    %21 = arith.addf %18, %20 : vector<8x256xf32>
    %22 = vector.extract_strided_slice %21 {offsets = [0, 0], sizes = [8, 128], strides = [1, 1]} : vector<8x256xf32> to vector<8x128xf32>
    %23 = vector.extract_strided_slice %21 {offsets = [0, 128], sizes = [8, 128], strides = [1, 1]} : vector<8x256xf32> to vector<8x128xf32>
    %c0_17 = arith.constant 0 : index
    %c0_18 = arith.constant 0 : index
    %24 = vector.load %arg2[%c0_17, %c0_18] : memref<8x128xf32, #tpu.memory_space<vmem>>, vector<8x128xf32>
    %cst_19 = arith.constant 5.000000e-01 : f32
    %25 = vector.broadcast %cst_19 : f32 to vector<8x128xf32>
    %26 = arith.mulf %25, %23 : vector<8x128xf32>
    %27 = math.exp %26 : vector<8x128xf32>
    %28 = arith.mulf %24, %27 : vector<8x128xf32>
    %29 = arith.addf %22, %28 : vector<8x128xf32>
    %30 = arith.truncf %29 : vector<8x128xf32> to vector<8x128xbf16>
    %c0_20 = arith.constant 0 : index
    %c0_21 = arith.constant 0 : index
    %31 = vector.load %arg9[%c0_20, %c0_21] : memref<128x256xbf16, #tpu.memory_space<vmem>>, vector<128x256xbf16>
    %cst_22 = arith.constant dense<0.000000e+00> : vector<8x256xf32>
    %32 = tpu.matmul %30, %31, %cst_22 {dimension_numbers = #tpu.dot_dimension_numbers<[1], [0], [0], [1], [0, 0, 1, 1], [], []>} : vector<8x128xbf16>, vector<128x256xbf16>, vector<8x256xf32> -> vector<8x256xf32>
    %c0_23 = arith.constant 0 : index
    %c0_24 = arith.constant 0 : index
    %33 = vector.load %arg10[%c0_23, %c0_24] : memref<1x256xf32, #tpu.memory_space<vmem>>, vector<1x256xf32>
    %34 = vector.broadcast %33 : vector<1x256xf32> to vector<8x256xf32>
    %35 = arith.addf %32, %34 : vector<8x256xf32>
    %cst_25 = arith.constant 0.000000e+00 : f32
    %36 = vector.broadcast %cst_25 : f32 to vector<8x256xf32>
    %37 = arith.maximumf %35, %36 : vector<8x256xf32>
    %38 = arith.truncf %37 : vector<8x256xf32> to vector<8x256xbf16>
    %c0_26 = arith.constant 0 : index
    %c0_27 = arith.constant 0 : index
    %39 = vector.load %arg11[%c0_26, %c0_27] : memref<256x256xbf16, #tpu.memory_space<vmem>>, vector<256x256xbf16>
    %cst_28 = arith.constant dense<0.000000e+00> : vector<8x256xf32>
    %40 = tpu.matmul %38, %39, %cst_28 {dimension_numbers = #tpu.dot_dimension_numbers<[1], [0], [0], [1], [0, 0, 1, 1], [], []>} : vector<8x256xbf16>, vector<256x256xbf16>, vector<8x256xf32> -> vector<8x256xf32>
    %c0_29 = arith.constant 0 : index
    %c0_30 = arith.constant 0 : index
    %41 = vector.load %arg12[%c0_29, %c0_30] : memref<1x256xf32, #tpu.memory_space<vmem>>, vector<1x256xf32>
    %42 = vector.broadcast %41 : vector<1x256xf32> to vector<8x256xf32>
    %43 = arith.addf %40, %42 : vector<8x256xf32>
    %cst_31 = arith.constant 0.000000e+00 : f32
    %44 = vector.broadcast %cst_31 : f32 to vector<8x256xf32>
    %45 = arith.maximumf %43, %44 : vector<8x256xf32>
    %46 = arith.truncf %45 : vector<8x256xf32> to vector<8x256xbf16>
    %c0_32 = arith.constant 0 : index
    %c0_33 = arith.constant 0 : index
    %47 = vector.load %arg13[%c0_32, %c0_33] : memref<256x256xbf16, #tpu.memory_space<vmem>>, vector<256x256xbf16>
    %cst_34 = arith.constant dense<0.000000e+00> : vector<8x256xf32>
    %48 = tpu.matmul %46, %47, %cst_34 {dimension_numbers = #tpu.dot_dimension_numbers<[1], [0], [0], [1], [0, 0, 1, 1], [], []>} : vector<8x256xbf16>, vector<256x256xbf16>, vector<8x256xf32> -> vector<8x256xf32>
    %c0_35 = arith.constant 0 : index
    %c0_36 = arith.constant 0 : index
    %49 = vector.load %arg14[%c0_35, %c0_36] : memref<1x256xf32, #tpu.memory_space<vmem>>, vector<1x256xf32>
    %50 = vector.broadcast %49 : vector<1x256xf32> to vector<8x256xf32>
    %51 = arith.addf %48, %50 : vector<8x256xf32>
    %52 = arith.negf %51 : vector<8x256xf32>
    %53 = math.exp %52 : vector<8x256xf32>
    %cst_37 = arith.constant 1.000000e+00 : f32
    %54 = vector.broadcast %cst_37 : f32 to vector<8x256xf32>
    %55 = arith.addf %54, %53 : vector<8x256xf32>
    %56 = arith.divf %54, %55 : vector<8x256xf32>
    %c0_38 = arith.constant 0 : index
    %c0_39 = arith.constant 0 : index
    %57 = vector.load %arg15[%c0_38, %c0_39] : memref<8x256xf32, #tpu.memory_space<vmem>>, vector<8x256xf32>
    tpu.vector_store %arg15[%c0_38, %c0_39], %56 {strides = array<i32>} : memref<8x256xf32, #tpu.memory_space<vmem>>, vector<8x256xf32>,
    %c0_40 = arith.constant 0 : index
    %c0_41 = arith.constant 0 : index
    %58 = vector.load %arg16[%c0_40, %c0_41] : memref<8x256xf32, #tpu.memory_space<vmem>>, vector<8x256xf32>
    tpu.vector_store %arg16[%c0_40, %c0_41], %21 {strides = array<i32>} : memref<8x256xf32, #tpu.memory_space<vmem>>, vector<8x256xf32>,
    return
  }
  func.func @transform_0(%arg0: i32) -> (i32, i32) {
    %c0_i32 = arith.constant 0 : i32
    %c0_i32_0 = arith.constant 0 : i32
    return %arg0, %c0_i32 : i32, i32
  }
  func.func @transform_1(%arg0: i32) -> (i32, i32) {
    %c0_i32 = arith.constant 0 : i32
    %c0_i32_0 = arith.constant 0 : i32
    return %arg0, %c0_i32 : i32, i32
  }
  func.func @transform_2(%arg0: i32) -> (i32, i32) {
    %c0_i32 = arith.constant 0 : i32
    %c0_i32_0 = arith.constant 0 : i32
    %c0_i32_1 = arith.constant 0 : i32
    return %c0_i32, %c0_i32_0 : i32, i32
  }
  func.func @transform_3(%arg0: i32) -> (i32, i32) {
    %c0_i32 = arith.constant 0 : i32
    %c0_i32_0 = arith.constant 0 : i32
    %c0_i32_1 = arith.constant 0 : i32
    return %c0_i32, %c0_i32_0 : i32, i32
  }
  func.func @transform_4(%arg0: i32) -> (i32, i32) {
    %c0_i32 = arith.constant 0 : i32
    %c0_i32_0 = arith.constant 0 : i32
    %c0_i32_1 = arith.constant 0 : i32
    return %c0_i32, %c0_i32_0 : i32, i32
  }
  func.func @transform_5(%arg0: i32) -> (i32, i32) {
    %c0_i32 = arith.constant 0 : i32
    %c0_i32_0 = arith.constant 0 : i32
    %c0_i32_1 = arith.constant 0 : i32
    return %c0_i32, %c0_i32_0 : i32, i32
  }
  func.func @transform_6(%arg0: i32) -> (i32, i32) {
    %c0_i32 = arith.constant 0 : i32
    %c0_i32_0 = arith.constant 0 : i32
    %c0_i32_1 = arith.constant 0 : i32
    return %c0_i32, %c0_i32_0 : i32, i32
  }
  func.func @transform_7(%arg0: i32) -> (i32, i32) {
    %c0_i32 = arith.constant 0 : i32
    %c0_i32_0 = arith.constant 0 : i32
    %c0_i32_1 = arith.constant 0 : i32
    return %c0_i32, %c0_i32_0 : i32, i32
  }
  func.func @transform_8(%arg0: i32) -> (i32, i32) {
    %c0_i32 = arith.constant 0 : i32
    %c0_i32_0 = arith.constant 0 : i32
    %c0_i32_1 = arith.constant 0 : i32
    return %c0_i32, %c0_i32_0 : i32, i32
  }
  func.func @transform_9(%arg0: i32) -> (i32, i32) {
    %c0_i32 = arith.constant 0 : i32
    %c0_i32_0 = arith.constant 0 : i32
    %c0_i32_1 = arith.constant 0 : i32
    return %c0_i32, %c0_i32_0 : i32, i32
  }
  func.func @transform_10(%arg0: i32) -> (i32, i32) {
    %c0_i32 = arith.constant 0 : i32
    %c0_i32_0 = arith.constant 0 : i32
    %c0_i32_1 = arith.constant 0 : i32
    return %c0_i32, %c0_i32_0 : i32, i32
  }
  func.func @transform_11(%arg0: i32) -> (i32, i32) {
    %c0_i32 = arith.constant 0 : i32
    %c0_i32_0 = arith.constant 0 : i32
    %c0_i32_1 = arith.constant 0 : i32
    return %c0_i32, %c0_i32_0 : i32, i32
  }
  func.func @transform_12(%arg0: i32) -> (i32, i32) {
    %c0_i32 = arith.constant 0 : i32
    %c0_i32_0 = arith.constant 0 : i32
    %c0_i32_1 = arith.constant 0 : i32
    return %c0_i32, %c0_i32_0 : i32, i32
  }
  func.func @transform_13(%arg0: i32) -> (i32, i32) {
    %c0_i32 = arith.constant 0 : i32
    %c0_i32_0 = arith.constant 0 : i32
    %c0_i32_1 = arith.constant 0 : i32
    return %c0_i32, %c0_i32_0 : i32, i32
  }
  func.func @transform_14(%arg0: i32) -> (i32, i32) {
    %c0_i32 = arith.constant 0 : i32
    %c0_i32_0 = arith.constant 0 : i32
    return %arg0, %c0_i32 : i32, i32
  }
  func.func @transform_15(%arg0: i32) -> (i32, i32) {
    %c0_i32 = arith.constant 0 : i32
    %c0_i32_0 = arith.constant 0 : i32
    return %arg0, %c0_i32 : i32, i32
  }
}

</mosaic_0001>

<bundles_post_ra>
// kernel: tpu_custom_call.1
= control target key start
LH: loop header
LB: loop body
LE: loop exit
PB: predicated region body
PF: predicated region fallthrough
CT: control target
= control target key end

     0   :  { %21 = vsyncpa [#allocation3], 0  ;;  %s2585_s0 = inlined_call_operand.hbm [shape: bf16[8,256], index: 0, kind: input, shape index: {}]   ;;  %s2586_s1 = inlined_call_operand.hbm [shape: f32[8,128], index: 1, kind: input, shape index: {}]   ;;  %s2587_s2 = inlined_call_operand.hbm [shape: bf16[256,256], index: 2, kind: input, shape index: {}]   ;;  %s2588_s3 = inlined_call_operand.vmem [shape: f32[1,256], index: 3, kind: input, shape index: {}]   ;;  %s2589_s4 = inlined_call_operand.hbm [shape: bf16[256,256], index: 4, kind: input, shape index: {}]   ;;  %s2590_s5 = inlined_call_operand.vmem [shape: f32[1,256], index: 5, kind: input, shape index: {}]   ;;  %s2591_s6 = inlined_call_operand.hbm [shape: bf16[256,256], index: 6, kind: input, shape index: {}]   ;;  %s2592_s7 = inlined_call_operand.vmem [shape: f32[1,256], index: 7, kind: input, shape index: {}]   ;;  %s2593_s8 = inlined_call_operand.hbm [shape: bf16[128,256], index: 8, kind: input, shape index: {}]   ;;  %s2594_s9 = inlined_call_operand.vmem [shape: f32[1,256], index: 9, kind: input, shape index: {}]   ;;  %s2595_s10 = inlined_call_operand.hbm [shape: bf16[256,256], index: 10, kind: input, shape index: {}]   ;;  %s2596_s11 = inlined_call_operand.vmem [shape: f32[1,256], index: 11, kind: input, shape index: {}]   ;;  %s2597_s12 = inlined_call_operand.hbm [shape: bf16[256,256], index: 12, kind: input, shape index: {}]   ;;  %s2598_s13 = inlined_call_operand.vmem [shape: f32[1,256], index: 13, kind: input, shape index: {}]   ;;  %s2599_s14 = inlined_call_operand.hbm [shape: f32[8,256], index: 14, kind: output, shape index: {0}]   ;;  %s2600_s15 = inlined_call_operand.hbm [shape: f32[8,256], index: 15, kind: output, shape index: {1}]  }
   0x1   :  { %22 = vsyncpa [#allocation6], 0 }
   0x2   :  { %23 = vsyncpa [#allocation9], 0 }
   0x3   :  { %24 = vsyncpa [#allocation12], 0 }
   0x4   :  { %25 = vsyncpa [#allocation15], 0 }
   0x5   :  { %26 = vsyncpa [#allocation4], 0 }
   0x6   :  { %27 = vsyncpa [#allocation18], 0  ;;  %s2314_s18 = smov [#allocation5]   ;;  %s2080_s22 = scalar_lea.hbm %s2586_s1, 128 }
   0x7   :  { %s44_s19 = sshll.u32 %s2314_s18, 4  ;;  %p2081_p0 = scmp.ne.s32.totalorder %s2586_s1, %s2080_s22  ;;  %s45_s19 = int_to_ptr.vmem [resolvable:$true] %s44_s19 }
   0x8   :  { %p2084_p1 = scmp.lt.u32.totalorder %s2080_s22, %s2586_s1 }
   0xa   :  { %p2086_p2 = pnand %p2084_p1, %p2081_p0 }
   0xc   :  { %2089 = shalt.err (!%p2086_p2)
}
   0xd   :  { %s2090_s27 = scalar_lea.vmem %s45_s19, 128  ;;  %p2095_p4 = scmp.lt.s32.totalorder %s45_s19, %s45_s19 }
   0xe   :  { %p2091_p3 = scmp.ne.s32.totalorder %s45_s19, %s2090_s27  ;;  %p2096_p5 = scmp.lt.s32.totalorder %s2090_s27, %s2090_s27 }
  0x10   :  { %p2097_p6 = por %p2096_p5, %p2095_p4 }
  0x12   :  { %p2098_p7 = pnand %p2097_p6, %p2091_p3 }
  0x14   :  { %2101 = shalt.err (!%p2098_p7)
}
  0x15   :  { %47 = dma.hbm_to_vmem [thread:$0]  %s2586_s1, 128, %s45_s19, [#allocation6]  }
  0x16   :  { %s2315_s30 = smov [#allocation8]   ;;  %s2316_s17 = smov [#allocation11]  }
  0x17   :  { %s67_s16 = sshll.u32 %s2315_s30, 4  ;;  %s95_s18 = sshll.u32 %s2316_s17, 4  ;;  %s68_s16 = int_to_ptr.vmem [resolvable:$true] %s67_s16  ;;  %s96_s18 = int_to_ptr.vmem [resolvable:$true] %s95_s18 }
  0x18   :  { %s2102_s22 = scalar_lea.hbm %s2589_s4, 4096 }
  0x19   :  { %p2103_p8 = scmp.ne.s32.totalorder %s2589_s4, %s2102_s22  ;;  %p2106_p9 = scmp.lt.u32.totalorder %s2102_s22, %s2589_s4 }
  0x1b   :  { %p2108_p10 = pnand %p2106_p9, %p2103_p8 }
  0x1d   :  { %2111 = shalt.err (!%p2108_p10)
}
  0x1e   :  { %s2112_s1 = scalar_lea.vmem %s68_s16, 4096  ;;  %p2117_p12 = scmp.lt.s32.totalorder %s68_s16, %s68_s16 }
  0x1f   :  { %p2113_p11 = scmp.ne.s32.totalorder %s68_s16, %s2112_s1  ;;  %p2118_p13 = scmp.lt.s32.totalorder %s2112_s1, %s2112_s1 }
  0x21   :  { %p2119_p0 = por %p2118_p13, %p2117_p12 }
  0x23   :  { %p2120_p1 = pnand %p2119_p0, %p2113_p11 }
  0x25   :  { %2123 = shalt.err (!%p2120_p1)
}
  0x26   :  { %s2317_s19 = smov 128   ;;  %s2318_s27 = smov 8  }
  0x27   :  { %73 = dma.hbm_to_vmem [thread:$0]  %s2589_s4, 4096, %s68_s16, [#allocation9], %s2317_s19, %s2317_s19, %s2318_s27  }
  0x28   :  { %s2124_s20 = scalar_lea.hbm %s2593_s8, 2048 }
  0x29   :  { %p2125_p2 = scmp.ne.s32.totalorder %s2593_s8, %s2124_s20  ;;  %p2128_p3 = scmp.lt.u32.totalorder %s2124_s20, %s2593_s8 }
  0x2b   :  { %p2130_p4 = pnand %p2128_p3, %p2125_p2 }
  0x2d   :  { %2133 = shalt.err (!%p2130_p4)
}
  0x2e   :  { %s2134_s25 = scalar_lea.vmem %s96_s18, 2048  ;;  %p2139_p6 = scmp.lt.s32.totalorder %s96_s18, %s96_s18 }
  0x2f   :  { %p2135_p5 = scmp.ne.s32.totalorder %s96_s18, %s2134_s25  ;;  %p2140_p7 = scmp.lt.s32.totalorder %s2134_s25, %s2134_s25 }
  0x31   :  { %p2141_p8 = por %p2140_p7, %p2139_p6 }
  0x33   :  { %p2142_p9 = pnand %p2141_p8, %p2135_p5 }
  0x35   :  { %2145 = shalt.err (!%p2142_p9)
}
  0x36   :  { %101 = dma.hbm_to_vmem [thread:$0]  %s2593_s8, 2048, %s96_s18, [#allocation12], %s2317_s19, %s2317_s19, %s2318_s27  }
  0x37   :  { %s2319_s26 = smov [#allocation2]   ;;  %s2320_s28 = smov [#allocation7]  }
  0x38   :  { %s34_s1 = sshll.u32 %s2319_s26, 4  ;;  %s53_s29 = sshll.u32 %s2320_s28, 4  ;;  %s35_s1 = int_to_ptr.vmem [resolvable:$true] %s34_s1  ;;  %s54_s29 = int_to_ptr.vmem [resolvable:$true] %s53_s29 }
  0x39   :  { %s2146_s20 = scalar_lea.hbm %s2585_s0, 128 }
  0x3a   :  { %p2147_p10 = scmp.ne.s32.totalorder %s2585_s0, %s2146_s20  ;;  %p2150_p11 = scmp.lt.u32.totalorder %s2146_s20, %s2585_s0 }
  0x3c   :  { %p2152_p12 = pnand %p2150_p11, %p2147_p10 }
  0x3e   :  { %2155 = shalt.err (!%p2152_p12)
}
  0x3f   :  { %s2156_s8 = scalar_lea.vmem %s35_s1, 128  ;;  %p2161_p0 = scmp.lt.s32.totalorder %s35_s1, %s35_s1 }
  0x40   :  { %p2157_p13 = scmp.ne.s32.totalorder %s35_s1, %s2156_s8  ;;  %p2162_p1 = scmp.lt.s32.totalorder %s2156_s8, %s2156_s8 }
  0x42   :  { %p2163_p2 = por %p2162_p1, %p2161_p0 }
  0x44   :  { %p2164_p3 = pnand %p2163_p2, %p2157_p13 }
  0x46   :  { %2167 = shalt.err (!%p2164_p3)
}
  0x47   :  { %37 = dma.hbm_to_vmem [thread:$0]  %s2585_s0, 128, %s35_s1, [#allocation3]  }
  0x48   :  { %s2168_s26 = scalar_lea.hbm %s2587_s2, 4096 }
  0x49   :  { %p2169_p4 = scmp.ne.s32.totalorder %s2587_s2, %s2168_s26  ;;  %p2172_p5 = scmp.lt.u32.totalorder %s2168_s26, %s2587_s2 }
  0x4b   :  { %p2174_p6 = pnand %p2172_p5, %p2169_p4 }
  0x4d   :  { %2177 = shalt.err (!%p2174_p6)
}
  0x4e   :  { %s2178_s21 = scalar_lea.vmem %s54_s29, 4096  ;;  %p2183_p8 = scmp.lt.s32.totalorder %s54_s29, %s54_s29 }
  0x4f   :  { %p2179_p7 = scmp.ne.s32.totalorder %s54_s29, %s2178_s21  ;;  %p2184_p9 = scmp.lt.s32.totalorder %s2178_s21, %s2178_s21 }
  0x51   :  { %p2185_p10 = por %p2184_p9, %p2183_p8 }
  0x53   :  { %p2186_p11 = pnand %p2185_p10, %p2179_p7 }
  0x55   :  { %2189 = shalt.err (!%p2186_p11)
}
  0x56   :  { %59 = dma.hbm_to_vmem [thread:$0]  %s2587_s2, 4096, %s54_s29, [#allocation6], %s2317_s19, %s2317_s19, %s2318_s27  }
  0x57   :  { %s2321_s22 = smov [#allocation10]   ;;  %s2322_s24 = smov [#allocation13]  }
  0x58   :  { %s81_s23 = sshll.u32 %s2321_s22, 4  ;;  %s109_s8 = sshll.u32 %s2322_s24, 4  ;;  %s82_s23 = int_to_ptr.vmem [resolvable:$true] %s81_s23  ;;  %s110_s8 = int_to_ptr.vmem [resolvable:$true] %s109_s8 }
  0x59   :  { %s2190_s4 = scalar_lea.hbm %s2591_s6, 4096 }
  0x5a   :  { %p2191_p12 = scmp.ne.s32.totalorder %s2591_s6, %s2190_s4  ;;  %p2194_p13 = scmp.lt.u32.totalorder %s2190_s4, %s2591_s6 }
  0x5c   :  { %p2196_p0 = pnand %p2194_p13, %p2191_p12 }
  0x5e   :  { %2199 = shalt.err (!%p2196_p0)
}
  0x5f   :  { %s2200_s2 = scalar_lea.vmem %s82_s23, 4096  ;;  %p2205_p2 = scmp.lt.s32.totalorder %s82_s23, %s82_s23 }
  0x60   :  { %p2201_p1 = scmp.ne.s32.totalorder %s82_s23, %s2200_s2  ;;  %p2206_p3 = scmp.lt.s32.totalorder %s2200_s2, %s2200_s2 }
  0x62   :  { %p2207_p4 = por %p2206_p3, %p2205_p2 }
  0x64   :  { %p2208_p5 = pnand %p2207_p4, %p2201_p1 }
  0x66   :  { %2211 = shalt.err (!%p2208_p5)
}
  0x67   :  { %87 = dma.hbm_to_vmem [thread:$0]  %s2591_s6, 4096, %s82_s23, [#allocation9], %s2317_s19, %s2317_s19, %s2318_s27  }
  0x68   :  { %s2212_s0 = scalar_lea.hbm %s2595_s10, 4096 }
  0x69   :  { %p2213_p6 = scmp.ne.s32.totalorder %s2595_s10, %s2212_s0  ;;  %p2216_p7 = scmp.lt.u32.totalorder %s2212_s0, %s2595_s10 }
  0x6b   :  { %p2218_p8 = pnand %p2216_p7, %p2213_p6 }
  0x6d   :  { %2221 = shalt.err (!%p2218_p8)
}
  0x6e   :  { %s2222_s25 = scalar_lea.vmem %s110_s8, 4096  ;;  %p2227_p10 = scmp.lt.s32.totalorder %s110_s8, %s110_s8 }
  0x6f   :  { %p2223_p9 = scmp.ne.s32.totalorder %s110_s8, %s2222_s25  ;;  %p2228_p11 = scmp.lt.s32.totalorder %s2222_s25, %s2222_s25 }
  0x71   :  { %p2229_p12 = por %p2228_p11, %p2227_p10 }
  0x73   :  { %p2230_p13 = pnand %p2229_p12, %p2223_p9 }
  0x75   :  { %2233 = shalt.err (!%p2230_p13)
}
  0x76   :  { %115 = dma.hbm_to_vmem [thread:$0]  %s2595_s10, 4096, %s110_s8, [#allocation12], %s2317_s19, %s2317_s19, %s2318_s27  }
  0x77   :  { %s2323_s4 = smov [#allocation14]   ;;  %s2234_s30 = scalar_lea.hbm %s2597_s12, 4096 }
  0x78   :  { %s123_s16 = sshll.u32 %s2323_s4, 4  ;;  %p2235_p0 = scmp.ne.s32.totalorder %s2597_s12, %s2234_s30  ;;  %s124_s16 = int_to_ptr.vmem [resolvable:$true] %s123_s16 }
  0x79   :  { %p2238_p1 = scmp.lt.u32.totalorder %s2234_s30, %s2597_s12 }
  0x7b   :  { %p2240_p2 = pnand %p2238_p1, %p2235_p0 }
  0x7d   :  { %2243 = shalt.err (!%p2240_p2)
}
  0x7e   :  { %s2244_s21 = scalar_lea.vmem %s124_s16, 4096  ;;  %p2249_p4 = scmp.lt.s32.totalorder %s124_s16, %s124_s16 }
  0x7f   :  { %p2245_p3 = scmp.ne.s32.totalorder %s124_s16, %s2244_s21  ;;  %p2250_p5 = scmp.lt.s32.totalorder %s2244_s21, %s2244_s21 }
  0x81   :  { %p2251_p6 = por %p2250_p5, %p2249_p4 }
  0x83   :  { %p2252_p7 = pnand %p2251_p6, %p2245_p3 }
  0x85   :  { %2255 = shalt.err (!%p2252_p7)
}
  0x86   :  { %129 = dma.hbm_to_vmem [thread:$0]  %s2597_s12, 4096, %s124_s16, [#allocation15], %s2317_s19, %s2317_s19, %s2318_s27  }
  0x87   :  { %2300 = dma.done.wait [#allocation3], 128  }
  0x88   :  { %2301 = vsyncadd [#allocation3], 4294967168 }
  0x89   :  { %2302 = dma.done.wait [#allocation6], 4224  }
  0x8a   :  { %2303 = vsyncadd [#allocation6], 4294963072 }
  0x8b   :  { %2304 = dma.done.wait [#allocation9], 8192  }
  0x8c   :  { %2305 = vsyncadd [#allocation9], 4294959104 }
  0x8d   :  { %2306 = dma.done.wait [#allocation12], 6144  }
  0x8e   :  { %2307 = vsyncadd [#allocation12], 4294961152 }
  0x8f   :  { %2308 = dma.done.wait [#allocation15], 4096  }
  0x90   :  { %2309 = vsyncadd [#allocation15], 4294963200  ;;  %v1804_v0 = vld [vmem:[#allocation7 + $0x4] ss:$8 sps:$4 sm:$0xff]   ;;  %v1806_v1 = vld [vmem:[#allocation7] ss:$8 sps:$4 sm:$0xff]  }
  0x91   :  { %369 = vmatprep.subr.bf16.mxu0 %v1804_v0  ;;  %v1807_v2 = vld [vmem:[#allocation7 + $0x14] ss:$8 sps:$4 sm:$0xff]   ;;  %v1809_v3 = vld [vmem:[#allocation7 + $0x10] ss:$8 sps:$4 sm:$0xff]   ;;  %v1810_v4 = vld [vmem:[#allocation7 + $0x24] ss:$8 sps:$4 sm:$0xff]  }
  0x92   :  { %370 = vmatpush1.bf16.msra.mxu0 %v1806_v1  ;;  %v1812_v5 = vld [vmem:[#allocation7 + $0x20] ss:$8 sps:$4 sm:$0xff]   ;;  %v1813_v6 = vld [vmem:[#allocation7 + $0x34] ss:$8 sps:$4 sm:$0xff]   ;;  %v1815_v7 = vld [vmem:[#allocation7 + $0x30] ss:$8 sps:$4 sm:$0xff]  }
  0x93   :  { %371 = vmatprep.subr.bf16.mxu0 %v1807_v2  ;;  %v1816_v8 = vld [vmem:[#allocation7 + $0x44] ss:$8 sps:$4 sm:$0xff]   ;;  %v1818_v9 = vld [vmem:[#allocation7 + $0x40] ss:$8 sps:$4 sm:$0xff]   ;;  %v1819_v10 = vld [vmem:[#allocation7 + $0x54] ss:$8 sps:$4 sm:$0xff]  }
  0x94   :  { %v1821_v11 = vld [vmem:[#allocation7 + $0x50] ss:$8 sps:$4 sm:$0xff]   ;;  %v1822_v12 = vld [vmem:[#allocation7 + $0x64] ss:$8 sps:$4 sm:$0xff]   ;;  %v1824_v13 = vld [vmem:[#allocation7 + $0x60] ss:$8 sps:$4 sm:$0xff]  }
  0x95   :  { %v2521_v14 = vld [vmem:[#allocation2] sm:$0xff]  ;;  %v1854_v16 = vld [vmem:[#allocation8 + $0x4] ss:$8 sps:$4 sm:$0xff]   ;;  %v1856_v17 = vld [vmem:[#allocation8] ss:$8 sps:$4 sm:$0xff]   ;;  %s2325_s24 = smov [#allocation17]  }
  0x96   :  { %372 = vmatpush1.bf16.msra.mxu0 %v1809_v3  ;;  %v1612_v15 = vcombine.high %v2521_v14, %v2521_v14  ;;  %v1857_v18 = vld [vmem:[#allocation8 + $0x14] ss:$8 sps:$4 sm:$0xff]   ;;  %618 = vmatprep.subr.bf16.mxu1 %v1854_v16  ;;  %v1827_v20 = vld [vmem:[#allocation7 + $0x70] ss:$8 sps:$4 sm:$0xff]   ;;  %v1860_v22 = vld [vmem:[#allocation8 + $0x24] ss:$8 sps:$4 sm:$0xff]   ;;  %v1611_v57 = vcombine.low %v2521_v14, %v2521_v14 }
  0x97   :  { %373 = vmatprep.subr.bf16.mxu0 %v1810_v4  ;;  %v1825_v19 = vld [vmem:[#allocation7 + $0x74] ss:$8 sps:$4 sm:$0xff]   ;;  %619 = vmatpush1.bf16.msra.mxu1 %v1856_v17  ;;  %v1859_v21 = vld [vmem:[#allocation8 + $0x10] ss:$8 sps:$4 sm:$0xff]   ;;  %v1828_v23 = vld [vmem:[#allocation7 + $0x84] ss:$8 sps:$4 sm:$0xff]  }
  0x98   :  { %401 = vmatprep.mubr.bf16.mxu0 %v1612_v15  ;;  %620 = vmatprep.subr.bf16.mxu1 %v1857_v18  ;;  %v1830_v24 = vld [vmem:[#allocation7 + $0x80] ss:$8 sps:$4 sm:$0xff]   ;;  %v1863_v26 = vld [vmem:[#allocation8 + $0x34] ss:$8 sps:$4 sm:$0xff]   ;;  %v1833_v28 = vld [vmem:[#allocation7 + $0x90] ss:$8 sps:$4 sm:$0xff]  }
  0x99   :  { %v1862_v25 = vld [vmem:[#allocation8 + $0x20] ss:$8 sps:$4 sm:$0xff]   ;;  %v1831_v27 = vld [vmem:[#allocation7 + $0x94] ss:$8 sps:$4 sm:$0xff]   ;;  %v1865_v29 = vld [vmem:[#allocation8 + $0x30] ss:$8 sps:$4 sm:$0xff]  }
  0x9a   :  { %374 = vmatpush1.bf16.msra.mxu0 %v1812_v5  ;;  %v1866_v30 = vld [vmem:[#allocation8 + $0x44] ss:$8 sps:$4 sm:$0xff]   ;;  %v1836_v32 = vld [vmem:[#allocation7 + $0xa0] ss:$8 sps:$4 sm:$0xff]   ;;  %v1869_v34 = vld [vmem:[#allocation8 + $0x54] ss:$8 sps:$4 sm:$0xff]  }
  0x9b   :  { %375 = vmatprep.subr.bf16.mxu0 %v1813_v6  ;;  %621 = vmatpush1.bf16.msra.mxu1 %v1859_v21  ;;  %v1834_v31 = vld [vmem:[#allocation7 + $0xa4] ss:$8 sps:$4 sm:$0xff]   ;;  %v1868_v33 = vld [vmem:[#allocation8 + $0x40] ss:$8 sps:$4 sm:$0xff]   ;;  %v1837_v35 = vld [vmem:[#allocation7 + $0xb4] ss:$8 sps:$4 sm:$0xff]  }
  0x9c   :  { %622 = vmatprep.subr.bf16.mxu1 %v1860_v22  ;;  %v1871_v36 = vld [vmem:[#allocation8 + $0x50] ss:$8 sps:$4 sm:$0xff]   ;;  %v1872_v38 = vld [vmem:[#allocation8 + $0x64] ss:$8 sps:$4 sm:$0xff]   ;;  %v1874_v40 = vld [vmem:[#allocation8 + $0x60] ss:$8 sps:$4 sm:$0xff]  }
  0x9d   :  { %v1839_v37 = vld [vmem:[#allocation7 + $0xb0] ss:$8 sps:$4 sm:$0xff]   ;;  %v1840_v39 = vld [vmem:[#allocation7 + $0xc4] ss:$8 sps:$4 sm:$0xff]   ;;  %v1842_v41 = vld [vmem:[#allocation7 + $0xc0] ss:$8 sps:$4 sm:$0xff]  }
  0x9e   :  { %376 = vmatpush1.bf16.msra.mxu0 %v1815_v7  ;;  %v1875_v42 = vld [vmem:[#allocation8 + $0x74] ss:$8 sps:$4 sm:$0xff]   ;;  %v1877_v44 = vld [vmem:[#allocation8 + $0x70] ss:$8 sps:$4 sm:$0xff]   ;;  %v1878_v46 = vld [vmem:[#allocation8 + $0x84] ss:$8 sps:$4 sm:$0xff]  }
  0x9f   :  { %377 = vmatprep.subr.bf16.mxu0 %v1816_v8  ;;  %623 = vmatpush1.bf16.msra.mxu1 %v1862_v25  ;;  %v1843_v43 = vld [vmem:[#allocation7 + $0xd4] ss:$8 sps:$4 sm:$0xff]   ;;  %v1845_v45 = vld [vmem:[#allocation7 + $0xd0] ss:$8 sps:$4 sm:$0xff]   ;;  %v1846_v47 = vld [vmem:[#allocation7 + $0xe4] ss:$8 sps:$4 sm:$0xff]  }
  0xa0   :  { %624 = vmatprep.subr.bf16.mxu1 %v1863_v26  ;;  %v1880_v48 = vld [vmem:[#allocation8 + $0x80] ss:$8 sps:$4 sm:$0xff]   ;;  %v1881_v50 = vld [vmem:[#allocation8 + $0x94] ss:$8 sps:$4 sm:$0xff]   ;;  %v1883_v52 = vld [vmem:[#allocation8 + $0x90] ss:$8 sps:$4 sm:$0xff]  }
  0xa1   :  { %v1848_v49 = vld [vmem:[#allocation7 + $0xe0] ss:$8 sps:$4 sm:$0xff]   ;;  %v1849_v51 = vld [vmem:[#allocation7 + $0xf4] ss:$8 sps:$4 sm:$0xff]   ;;  %v1851_v53 = vld [vmem:[#allocation7 + $0xf0] ss:$8 sps:$4 sm:$0xff]  }
  0xa2   :  { %378 = vmatpush1.bf16.msra.mxu0 %v1818_v9  ;;  %v1884_v54 = vld [vmem:[#allocation8 + $0xa4] ss:$8 sps:$4 sm:$0xff]   ;;  %v1886_v55 = vld [vmem:[#allocation8 + $0xa0] ss:$8 sps:$4 sm:$0xff]   ;;  %v1887_v56 = vld [vmem:[#allocation8 + $0xb4] ss:$8 sps:$4 sm:$0xff]  }
  0xa3   :  { %379 = vmatprep.subr.bf16.mxu0 %v1819_v10  ;;  %625 = vmatpush1.bf16.msra.mxu1 %v1865_v29  ;;  %v1889_v58 = vld [vmem:[#allocation8 + $0xb0] ss:$8 sps:$4 sm:$0xff]   ;;  %v1890_v59 = vld [vmem:[#allocation8 + $0xc4] ss:$8 sps:$4 sm:$0xff]   ;;  %v1892_v60 = vld [vmem:[#allocation8 + $0xc0] ss:$8 sps:$4 sm:$0xff]  }
  0xa4   :  { %626 = vmatprep.subr.bf16.mxu1 %v1866_v30  ;;  %v1893_v61 = vld [vmem:[#allocation8 + $0xd4] ss:$8 sps:$4 sm:$0xff]   ;;  %v1895_v62 = vld [vmem:[#allocation8 + $0xd0] ss:$8 sps:$4 sm:$0xff]   ;;  %v1896_v63 = vld [vmem:[#allocation8 + $0xe4] ss:$8 sps:$4 sm:$0xff]  }
  0xa5   :  { %v1898_v0 = vld [vmem:[#allocation8 + $0xe0] ss:$8 sps:$4 sm:$0xff]   ;;  %v1899_v1 = vld [vmem:[#allocation8 + $0xf4] ss:$8 sps:$4 sm:$0xff]   ;;  %v1901_v2 = vld [vmem:[#allocation8 + $0xf0] ss:$8 sps:$4 sm:$0xff]  }
  0xa6   :  { %380 = vmatpush1.bf16.msra.mxu0 %v1821_v11  ;;  %v1902_v3 = vld [vmem:[#allocation10] ss:$8 sps:$4 sm:$0xff]   ;;  %v1904_v4 = vld [vmem:[#allocation10 + $0x4] ss:$8 sps:$4 sm:$0xff]   ;;  %v1907_v5 = vld [vmem:[#allocation10 + $0x14] ss:$8 sps:$4 sm:$0xff]  }
  0xa7   :  { %381 = vmatprep.subr.bf16.mxu0 %v1822_v12  ;;  %627 = vmatpush1.bf16.msra.mxu1 %v1868_v33  ;;  %v1905_v6 = vld [vmem:[#allocation10 + $0x10] ss:$8 sps:$4 sm:$0xff]   ;;  %v1910_v7 = vld [vmem:[#allocation10 + $0x24] ss:$8 sps:$4 sm:$0xff]   ;;  %v1908_v8 = vld [vmem:[#allocation10 + $0x20] ss:$8 sps:$4 sm:$0xff]  }
  0xa8   :  { %628 = vmatprep.subr.bf16.mxu1 %v1869_v34  ;;  %v1913_v9 = vld [vmem:[#allocation10 + $0x34] ss:$8 sps:$4 sm:$0xff]   ;;  %v1911_v10 = vld [vmem:[#allocation10 + $0x30] ss:$8 sps:$4 sm:$0xff]   ;;  %v1916_v11 = vld [vmem:[#allocation10 + $0x44] ss:$8 sps:$4 sm:$0xff]  }
  0xa9   :  { %v1914_v12 = vld [vmem:[#allocation10 + $0x40] ss:$8 sps:$4 sm:$0xff]   ;;  %v1917_v14 = vld [vmem:[#allocation10 + $0x50] ss:$8 sps:$4 sm:$0xff]   ;;  %v1922_v15 = vld [vmem:[#allocation10 + $0x64] ss:$8 sps:$4 sm:$0xff]  }
  0xaa   :  { %382 = vmatpush1.bf16.msra.mxu0 %v1824_v13  ;;  %v1919_v13 = vld [vmem:[#allocation10 + $0x54] ss:$8 sps:$4 sm:$0xff]   ;;  %v1920_v16 = vld [vmem:[#allocation10 + $0x60] ss:$8 sps:$4 sm:$0xff]   ;;  %v1923_v18 = vld [vmem:[#allocation10 + $0x70] ss:$8 sps:$4 sm:$0xff]  }
  0xab   :  { %383 = vmatprep.subr.bf16.mxu0 %v1825_v19  ;;  %629 = vmatpush1.bf16.msra.mxu1 %v1871_v36  ;;  %v1925_v17 = vld [vmem:[#allocation10 + $0x74] ss:$8 sps:$4 sm:$0xff]   ;;  %v1928_v19 = vld [vmem:[#allocation10 + $0x84] ss:$8 sps:$4 sm:$0xff]   ;;  %v1929_v22 = vld [vmem:[#allocation10 + $0x90] ss:$8 sps:$4 sm:$0xff]  }
  0xac   :  { %630 = vmatprep.subr.bf16.mxu1 %v1872_v38  ;;  %v1931_v21 = vld [vmem:[#allocation10 + $0x94] ss:$8 sps:$4 sm:$0xff]   ;;  %v1935_v26 = vld [vmem:[#allocation10 + $0xb0] ss:$8 sps:$4 sm:$0xff]   ;;  %s1594_s18 = sshll.u32 %s2325_s24, 4  ;;  %s1595_s18 = int_to_ptr.vmem [resolvable:$true] %s1594_s18 }
  0xad   :  { %v1937_v25 = vld [vmem:[#allocation10 + $0xb4] ss:$8 sps:$4 sm:$0xff]   ;;  %v1941_v30 = vld [vmem:[#allocation10 + $0xd0] ss:$8 sps:$4 sm:$0xff]   ;;  %p2261_p9 = scmp.lt.s32.totalorder %s1595_s18, %s1595_s18 }
  0xae   :  { %384 = vmatpush1.bf16.msra.mxu0 %v1827_v20  ;;  %v1926_v20 = vld [vmem:[#allocation10 + $0x80] ss:$8 sps:$4 sm:$0xff]   ;;  %v1943_v29 = vld [vmem:[#allocation10 + $0xd4] ss:$8 sps:$4 sm:$0xff]   ;;  %v190_v34 = vld [vmem:[%s2588_s3] sm:$0x3] }
  0xaf   :  { %385 = vmatprep.subr.bf16.mxu0 %v1828_v23  ;;  %631 = vmatpush1.bf16.msra.mxu1 %v1874_v40  ;;  %v1934_v23 = vld [vmem:[#allocation10 + $0xa4] ss:$8 sps:$4 sm:$0xff]  }
  0xb0   :  { %632 = vmatprep.subr.bf16.mxu1 %v1875_v42 }
  0xb2   :  { %386 = vmatpush1.bf16.msra.mxu0 %v1830_v24  ;;  %v1932_v24 = vld [vmem:[#allocation10 + $0xa0] ss:$8 sps:$4 sm:$0xff]  }
  0xb3   :  { %387 = vmatprep.subr.bf16.mxu0 %v1831_v27  ;;  %633 = vmatpush1.bf16.msra.mxu1 %v1877_v44  ;;  %v1940_v27 = vld [vmem:[#allocation10 + $0xc4] ss:$8 sps:$4 sm:$0xff]  }
  0xb4   :  { %634 = vmatprep.subr.bf16.mxu1 %v1878_v46 }
  0xb6   :  { %388 = vmatpush1.bf16.msra.mxu0 %v1833_v28  ;;  %v1938_v28 = vld [vmem:[#allocation10 + $0xc0] ss:$8 sps:$4 sm:$0xff]  }
  0xb7   :  { %389 = vmatprep.subr.bf16.mxu0 %v1834_v31  ;;  %635 = vmatpush1.bf16.msra.mxu1 %v1880_v48  ;;  %v192_v31 = vlaneseq  ;;  %v1946_v48 = vld [vmem:[#allocation10 + $0xe4] ss:$8 sps:$4 sm:$0xff]  }
  0xb8   :  { %636 = vmatprep.subr.bf16.mxu1 %v1881_v50  ;;  %v1949_v50 = vld [vmem:[#allocation10 + $0xf4] ss:$8 sps:$4 sm:$0xff]  }
  0xba   :  { %390 = vmatpush1.bf16.msra.mxu0 %v1836_v32  ;;  %v193_v32 = vshrl.u32 %v192_v31, 7 }
  0xbb   :  { %391 = vmatprep.subr.bf16.mxu0 %v1837_v35  ;;  %637 = vmatpush1.bf16.msra.mxu1 %v1883_v52  ;;  %v1950_v52 = vld [vmem:[#allocation11] ss:$8 sps:$4 sm:$0xff]  }
  0xbc   :  { %638 = vmatprep.subr.bf16.mxu1 %v1884_v54  ;;  %v2527_v33 = vsub.s32 0, %v193_v32  ;;  %v2532_v35 = vsub.s32 1, %v193_v32  ;;  %v1955_v54 = vld [vmem:[#allocation11 + $0x14] ss:$8 sps:$4 sm:$0xff]  }
  0xbe   :  { %392 = vmatpush1.bf16.msra.mxu0 %v1839_v37  ;;  %v195_v36 = vrot.slane %v190_v34, %v2527_v33  ;;  %v199_v37 = vrot.slane %v190_v34, %v2532_v35 }
  0xbf   :  { %393 = vmatprep.subr.bf16.mxu0 %v1840_v39  ;;  %639 = vmatpush1.bf16.msra.mxu1 %v1886_v55  ;;  %v1953_v55 = vld [vmem:[#allocation11 + $0x10] ss:$8 sps:$4 sm:$0xff]  }
  0xc0   :  { %640 = vmatprep.subr.bf16.mxu1 %v1887_v56  ;;  %v446_v56 = vld [vmem:[%s2590_s5] sm:$0x3] }
  0xc2   :  { %394 = vmatpush1.bf16.msra.mxu0 %v1842_v41 }
  0xc3   :  { %395 = vmatprep.subr.bf16.mxu0 %v1843_v43  ;;  %641 = vmatpush1.bf16.msra.mxu1 %v1889_v58  ;;  %v455_v58 = vrot.slane %v446_v56, %v2532_v35 }
  0xc4   :  { %642 = vmatprep.subr.bf16.mxu1 %v1890_v59 }
  0xc6   :  { %396 = vmatpush1.bf16.msra.mxu0 %v1845_v45 }
  0xc7   :  { %397 = vmatprep.subr.bf16.mxu0 %v1846_v47  ;;  %643 = vmatpush1.bf16.msra.mxu1 %v1892_v60 }
  0xc8   :  { %644 = vmatprep.subr.bf16.mxu1 %v1893_v61 }
  0xca   :  { %398 = vmatpush1.bf16.msra.mxu0 %v1848_v49  ;;  %v1944_v49 = vld [vmem:[#allocation10 + $0xe0] ss:$8 sps:$4 sm:$0xff]  }
  0xcb   :  { %399 = vmatprep.subr.bf16.mxu0 %v1849_v51  ;;  %645 = vmatpush1.bf16.msra.mxu1 %v1895_v62  ;;  %v1947_v51 = vld [vmem:[#allocation10 + $0xf0] ss:$8 sps:$4 sm:$0xff]  }
  0xcc   :  { %646 = vmatprep.subr.bf16.mxu1 %v1896_v63 }
  0xce   :  { %400 = vmatpush1.bf16.msra.mxu0 %v1851_v53  ;;  %v1952_v53 = vld [vmem:[#allocation11 + $0x4] ss:$8 sps:$4 sm:$0xff]  }
  0xcf   :  { %647 = vmatpush1.bf16.msra.mxu1 %v1898_v0  ;;  %867 = vmatprep.subr.bf16.mxu0 %v1904_v4 }
  0xd0   :  { %648 = vmatprep.subr.bf16.mxu1 %v1899_v1 }
  0xd1   :  { %402 = vmatmul.mubr.bf16.vlgmr.msra.gmra.mrb[0].mxu0 %v1611_v57  ;;  %v451_v57 = vrot.slane %v446_v56, %v2527_v33  ;;  %v2006_v56 = vld [vmem:[#allocation13 + $0xa4] ss:$8 sps:$4 sm:$0xff]  }
  0xd2   :  { %868 = vmatpush1.bf16.msra.mxu0 %v1902_v3 }
  0xd3   :  { %649 = vmatpush1.bf16.msra.mxu1 %v1901_v2  ;;  %869 = vmatprep.subr.bf16.mxu0 %v1907_v5  ;;  %v1958_v5 = vld [vmem:[#allocation11 + $0x24] ss:$8 sps:$4 sm:$0xff]  }
  0xd4   :  { %1023 = vmatprep.subr.bf16.mxu1 %v1952_v53  ;;  %v1998_v53 = vld [vmem:[#allocation13 + $0x80] ss:$8 sps:$4 sm:$0xff]  }
  0xd6   :  { %870 = vmatpush1.bf16.msra.mxu0 %v1905_v6  ;;  %v1956_v6 = vld [vmem:[#allocation11 + $0x20] ss:$8 sps:$4 sm:$0xff]  }
  0xd7   :  { %871 = vmatprep.subr.bf16.mxu0 %v1910_v7  ;;  %v1961_v7 = vld [vmem:[#allocation11 + $0x34] ss:$8 sps:$4 sm:$0xff]  }
  0xda   :  { %872 = vmatpush1.bf16.msra.mxu0 %v1908_v8  ;;  %v1959_v8 = vld [vmem:[#allocation11 + $0x30] ss:$8 sps:$4 sm:$0xff]  }
  0xdb   :  { %873 = vmatprep.subr.bf16.mxu0 %v1913_v9  ;;  %v1964_v9 = vld [vmem:[#allocation11 + $0x44] ss:$8 sps:$4 sm:$0xff]  }
  0xde   :  { %874 = vmatpush1.bf16.msra.mxu0 %v1911_v10  ;;  %v1962_v10 = vld [vmem:[#allocation11 + $0x40] ss:$8 sps:$4 sm:$0xff]  }
  0xdf   :  { %875 = vmatprep.subr.bf16.mxu0 %v1916_v11  ;;  %v1967_v11 = vld [vmem:[#allocation11 + $0x54] ss:$8 sps:$4 sm:$0xff]  }
  0xe2   :  { %876 = vmatpush1.bf16.msra.mxu0 %v1914_v12  ;;  %v1965_v12 = vld [vmem:[#allocation11 + $0x50] ss:$8 sps:$4 sm:$0xff]  }
  0xe3   :  { %877 = vmatprep.subr.bf16.mxu0 %v1919_v13  ;;  %v1970_v13 = vld [vmem:[#allocation11 + $0x64] ss:$8 sps:$4 sm:$0xff]  }
  0xe6   :  { %878 = vmatpush1.bf16.msra.mxu0 %v1917_v14  ;;  %v2324_v14 = vmov 0  }
  0xe7   :  { %879 = vmatprep.subr.bf16.mxu0 %v1922_v15  ;;  %v1968_v15 = vld [vmem:[#allocation11 + $0x60] ss:$8 sps:$4 sm:$0xff]  }
  0xea   :  { %880 = vmatpush1.bf16.msra.mxu0 %v1920_v16  ;;  %v1973_v16 = vld [vmem:[#allocation11 + $0x74] ss:$8 sps:$4 sm:$0xff]  }
  0xeb   :  { %881 = vmatprep.subr.bf16.mxu0 %v1925_v17  ;;  %v1971_v17 = vld [vmem:[#allocation11 + $0x70] ss:$8 sps:$4 sm:$0xff]  }
  0xee   :  { %882 = vmatpush1.bf16.msra.mxu0 %v1923_v18  ;;  %v1976_v18 = vld [vmem:[#allocation13 + $0x4] ss:$8 sps:$4 sm:$0xff]  }
  0xef   :  { %883 = vmatprep.subr.bf16.mxu0 %v1928_v19  ;;  %v695_v19 = vld [vmem:[%s2592_s7] sm:$0x3] }
  0xf2   :  { %884 = vmatpush1.bf16.msra.mxu0 %v1926_v20  ;;  %v700_v20 = vrot.slane %v695_v19, %v2527_v33 }
  0xf3   :  { %885 = vmatprep.subr.bf16.mxu0 %v1931_v21  ;;  %v704_v21 = vrot.slane %v695_v19, %v2532_v35  ;;  %v2043_v19 = vld [vmem:[#allocation14 + $0x70] ss:$8 sps:$4 sm:$0xff]  }
  0xf6   :  { %886 = vmatpush1.bf16.msra.mxu0 %v1929_v22 }
  0xf7   :  { %887 = vmatprep.subr.bf16.mxu0 %v1934_v23 }
  0xfa   :  { %888 = vmatpush1.bf16.msra.mxu0 %v1932_v24 }
  0xfb   :  { %889 = vmatprep.subr.bf16.mxu0 %v1937_v25 }
  0xfe   :  { %890 = vmatpush1.bf16.msra.mxu0 %v1935_v26 }
  0xff   :  { %891 = vmatprep.subr.bf16.mxu0 %v1940_v27 }
 0x102   :  { %892 = vmatpush1.bf16.msra.mxu0 %v1938_v28 }
 0x103   :  { %893 = vmatprep.subr.bf16.mxu0 %v1943_v29 }
 0x106   :  { %894 = vmatpush1.bf16.msra.mxu0 %v1941_v30  ;;  %v908_v30 = vld [vmem:[#allocation5] sm:$0xff] }
 0x107   :  { %895 = vmatprep.subr.bf16.mxu0 %v1946_v48  ;;  %v1994_v48 = vld [vmem:[#allocation13 + $0x64] ss:$8 sps:$4 sm:$0xff]  }
 0x10a   :  { %896 = vmatpush1.bf16.msra.mxu0 %v1944_v49  ;;  %v1992_v49 = vld [vmem:[#allocation13 + $0x60] ss:$8 sps:$4 sm:$0xff]  }
 0x10b   :  { %897 = vmatprep.subr.bf16.mxu0 %v1949_v50  ;;  %v1997_v50 = vld [vmem:[#allocation13 + $0x74] ss:$8 sps:$4 sm:$0xff]  }
 0x10e   :  { %898 = vmatpush1.bf16.msra.mxu0 %v1947_v51  ;;  %v1995_v51 = vld [vmem:[#allocation13 + $0x70] ss:$8 sps:$4 sm:$0xff]  }
 0x1a4   :  { %v403_v38 = vpop.f32.mrb[0].mxu0 }
 0x1a5   :  { %v404_v39 = vadd.f32 %v403_v38, %v195_v36  ;;  %v405_v40 = vpop.f32.mrb[1].mxu0  ;;  %v1974_v36 = vld [vmem:[#allocation13] ss:$8 sps:$4 sm:$0xff]   ;;  %v1979_v38 = vld [vmem:[#allocation13 + $0x14] ss:$8 sps:$4 sm:$0xff]  }
 0x1a6   :  { %v406_v41 = vadd.f32 %v405_v40, %v199_v37  ;;  %v407_v42 = vpop.f32.mrb[2].mxu0  ;;  %v1982_v40 = vld [vmem:[#allocation13 + $0x24] ss:$8 sps:$4 sm:$0xff]  }
 0x1a7   :  { %v410_v43 = vmax.f32 %v404_v39, 0.0  ;;  %v408_v44 = vpop.f32.mrb[3].mxu0  ;;  %v1977_v39 = vld [vmem:[#allocation13 + $0x10] ss:$8 sps:$4 sm:$0xff]   ;;  %v1985_v42 = vld [vmem:[#allocation13 + $0x34] ss:$8 sps:$4 sm:$0xff]  }
 0x1a8   :  { %v411_v45 = vmax.f32 %v406_v41, 0.0  ;;  %v1980_v41 = vld [vmem:[#allocation13 + $0x20] ss:$8 sps:$4 sm:$0xff]   ;;  %v1988_v44 = vld [vmem:[#allocation13 + $0x44] ss:$8 sps:$4 sm:$0xff]  }
 0x1a9   :  { %v412_v47 = vpack.c.bf16 %v410_v43, %v410_v43  ;;  %v1983_v43 = vld [vmem:[#allocation13 + $0x30] ss:$8 sps:$4 sm:$0xff]  }
 0x1aa   :  { %v413_v46 = vpack.c.bf16 %v411_v45, %v411_v45  ;;  %v1986_v45 = vld [vmem:[#allocation13 + $0x40] ss:$8 sps:$4 sm:$0xff]  }
 0x1ac   :  { %650 = vmatprep.mubr.bf16.mxu1 %v413_v46  ;;  %v1991_v46 = vld [vmem:[#allocation13 + $0x54] ss:$8 sps:$4 sm:$0xff]  }
 0x1ad   :  { %651 = vmatmul.mubr.bf16.vlgmr.msra.gmra.mrb[0].mxu1 %v412_v47  ;;  %v1989_v47 = vld [vmem:[#allocation13 + $0x50] ss:$8 sps:$4 sm:$0xff]  }
 0x1ae   :  { %1024 = vmatpush1.bf16.msra.mxu1 %v1950_v52  ;;  %1055 = vmatprep.mubr.bf16.mxu1 %v2324_v14  ;;  %v2000_v52 = vld [vmem:[#allocation13 + $0x84] ss:$8 sps:$4 sm:$0xff]   ;;  %v2039_v14 = vld [vmem:[#allocation14 + $0x54] ss:$8 sps:$4 sm:$0xff]  }
 0x1af   :  { %1025 = vmatprep.subr.bf16.mxu1 %v1955_v54  ;;  %v2003_v54 = vld [vmem:[#allocation13 + $0x94] ss:$8 sps:$4 sm:$0xff]  }
 0x1b2   :  { %1026 = vmatpush1.bf16.msra.mxu1 %v1953_v55  ;;  %v2001_v55 = vld [vmem:[#allocation13 + $0x90] ss:$8 sps:$4 sm:$0xff]  }
 0x1b3   :  { %1027 = vmatprep.subr.bf16.mxu1 %v1958_v5  ;;  %v2024_v5 = vld [vmem:[#allocation14 + $0x4] ss:$8 sps:$4 sm:$0xff]  }
 0x1b4   :  { %1521 = vmatprep.subr.bf16.mxu0 %v2024_v5 }
 0x1b6   :  { %1028 = vmatpush1.bf16.msra.mxu1 %v1956_v6  ;;  %v2027_v6 = vld [vmem:[#allocation14 + $0x14] ss:$8 sps:$4 sm:$0xff]  }
 0x1b7   :  { %1029 = vmatprep.subr.bf16.mxu1 %v1961_v7  ;;  %v2025_v7 = vld [vmem:[#allocation14 + $0x10] ss:$8 sps:$4 sm:$0xff]  }
 0x1ba   :  { %1030 = vmatpush1.bf16.msra.mxu1 %v1959_v8  ;;  %v2030_v8 = vld [vmem:[#allocation14 + $0x24] ss:$8 sps:$4 sm:$0xff]  }
 0x1bb   :  { %1031 = vmatprep.subr.bf16.mxu1 %v1964_v9  ;;  %v2028_v9 = vld [vmem:[#allocation14 + $0x20] ss:$8 sps:$4 sm:$0xff]  }
 0x1be   :  { %1032 = vmatpush1.bf16.msra.mxu1 %v1962_v10  ;;  %v2033_v10 = vld [vmem:[#allocation14 + $0x34] ss:$8 sps:$4 sm:$0xff]  }
 0x1bf   :  { %1033 = vmatprep.subr.bf16.mxu1 %v1967_v11  ;;  %v2031_v11 = vld [vmem:[#allocation14 + $0x30] ss:$8 sps:$4 sm:$0xff]  }
 0x1c2   :  { %1034 = vmatpush1.bf16.msra.mxu1 %v1965_v12  ;;  %v2036_v12 = vld [vmem:[#allocation14 + $0x44] ss:$8 sps:$4 sm:$0xff]  }
 0x1c3   :  { %1035 = vmatprep.subr.bf16.mxu1 %v1970_v13  ;;  %v2034_v13 = vld [vmem:[#allocation14 + $0x40] ss:$8 sps:$4 sm:$0xff]  }
 0x1c6   :  { %1036 = vmatpush1.bf16.msra.mxu1 %v1968_v15  ;;  %v2037_v15 = vld [vmem:[#allocation14 + $0x50] ss:$8 sps:$4 sm:$0xff]  }
 0x1c7   :  { %1037 = vmatprep.subr.bf16.mxu1 %v1973_v16  ;;  %v2042_v16 = vld [vmem:[#allocation14 + $0x64] ss:$8 sps:$4 sm:$0xff]  }
 0x1ca   :  { %1038 = vmatpush1.bf16.msra.mxu1 %v1971_v17  ;;  %v2040_v17 = vld [vmem:[#allocation14 + $0x60] ss:$8 sps:$4 sm:$0xff]  }
 0x1cb   :  { %1272 = vmatprep.subr.bf16.mxu1 %v1976_v18  ;;  %v2045_v18 = vld [vmem:[#allocation14 + $0x74] ss:$8 sps:$4 sm:$0xff]  }
 0x280   :  { %v652_v59 = vpop.f32.mrb[0].mxu1 }
 0x281   :  { %v653_v60 = vadd.f32 %v652_v59, %v451_v57  ;;  %v654_v61 = vpop.f32.mrb[1].mxu1  ;;  %v2004_v57 = vld [vmem:[#allocation13 + $0xa0] ss:$8 sps:$4 sm:$0xff]   ;;  %v2007_v59 = vld [vmem:[#allocation13 + $0xb0] ss:$8 sps:$4 sm:$0xff]  }
 0x282   :  { %v655_v62 = vadd.f32 %v654_v61, %v455_v58  ;;  %v656_v63 = vpop.f32.mrb[2].mxu1  ;;  %v2009_v58 = vld [vmem:[#allocation13 + $0xb4] ss:$8 sps:$4 sm:$0xff]   ;;  %v2010_v61 = vld [vmem:[#allocation13 + $0xc0] ss:$8 sps:$4 sm:$0xff]  }
 0x283   :  { %v659_v0 = vmax.f32 %v653_v60, 0.0  ;;  %v657_v1 = vpop.f32.mrb[3].mxu1  ;;  %v2012_v60 = vld [vmem:[#allocation13 + $0xc4] ss:$8 sps:$4 sm:$0xff]   ;;  %v2013_v63 = vld [vmem:[#allocation13 + $0xd0] ss:$8 sps:$4 sm:$0xff]  }
 0x284   :  { %v660_v2 = vmax.f32 %v655_v62, 0.0  ;;  %v2015_v62 = vld [vmem:[#allocation13 + $0xd4] ss:$8 sps:$4 sm:$0xff]   ;;  %v2016_v1 = vld [vmem:[#allocation13 + $0xe0] ss:$8 sps:$4 sm:$0xff]  }
 0x285   :  { %v661_v4 = vpack.c.bf16 %v659_v0, %v659_v0  ;;  %v2018_v0 = vld [vmem:[#allocation13 + $0xe4] ss:$8 sps:$4 sm:$0xff]  }
 0x286   :  { %v662_v3 = vpack.c.bf16 %v660_v2, %v660_v2  ;;  %v2021_v2 = vld [vmem:[#allocation13 + $0xf4] ss:$8 sps:$4 sm:$0xff]  }
 0x288   :  { %899 = vmatprep.mubr.bf16.mxu0 %v662_v3  ;;  %v2019_v3 = vld [vmem:[#allocation13 + $0xf0] ss:$8 sps:$4 sm:$0xff]  }
 0x289   :  { %900 = vmatmul.mubr.bf16.vlgmr.msra.gmra.mrb[4].mxu0 %v661_v4  ;;  %v2022_v4 = vld [vmem:[#allocation14] ss:$8 sps:$4 sm:$0xff]  }
 0x28a   :  { %1522 = vmatpush1.bf16.msra.mxu0 %v2022_v4 }
 0x28b   :  { %1523 = vmatprep.subr.bf16.mxu0 %v2027_v6 }
 0x28e   :  { %1524 = vmatpush1.bf16.msra.mxu0 %v2025_v7 }
 0x28f   :  { %1525 = vmatprep.subr.bf16.mxu0 %v2030_v8 }
 0x292   :  { %1526 = vmatpush1.bf16.msra.mxu0 %v2028_v9 }
 0x293   :  { %1527 = vmatprep.subr.bf16.mxu0 %v2033_v10 }
 0x296   :  { %1528 = vmatpush1.bf16.msra.mxu0 %v2031_v11 }
 0x297   :  { %1529 = vmatprep.subr.bf16.mxu0 %v2036_v12 }
 0x29a   :  { %1530 = vmatpush1.bf16.msra.mxu0 %v2034_v13 }
 0x29b   :  { %1531 = vmatprep.subr.bf16.mxu0 %v2039_v14 }
 0x29e   :  { %1532 = vmatpush1.bf16.msra.mxu0 %v2037_v15 }
 0x29f   :  { %1533 = vmatprep.subr.bf16.mxu0 %v2042_v16 }
 0x2a2   :  { %1534 = vmatpush1.bf16.msra.mxu0 %v2040_v17 }
 0x2a3   :  { %1535 = vmatprep.subr.bf16.mxu0 %v2045_v18 }
 0x2a6   :  { %1536 = vmatpush1.bf16.msra.mxu0 %v2043_v19 }
 0x35c   :  { %v901_v22 = vpop.f32.mrb[4].mxu0 }
 0x35d   :  { %v902_v23 = vadd.f32 %v901_v22, %v700_v20  ;;  %v903_v24 = vpop.f32.mrb[5].mxu0  ;;  %v2048_v20 = vld [vmem:[#allocation14 + $0x84] ss:$8 sps:$4 sm:$0xff]   ;;  %v2051_v22 = vld [vmem:[#allocation14 + $0x94] ss:$8 sps:$4 sm:$0xff]  }
 0x35e   :  { %v904_v25 = vadd.f32 %v903_v24, %v704_v21  ;;  %v905_v26 = vpop.f32.mrb[6].mxu0  ;;  %v2046_v21 = vld [vmem:[#allocation14 + $0x80] ss:$8 sps:$4 sm:$0xff]   ;;  %1537 = vmatprep.subr.bf16.mxu0 %v2048_v20  ;;  %v2054_v24 = vld [vmem:[#allocation14 + $0xa4] ss:$8 sps:$4 sm:$0xff]  }
 0x35f   :  { %1576 = vst [vmem:[#allocation17] sm:$0xff] %v902_v23  ;;  %v906_v27 = vpop.f32.mrb[7].mxu0  ;;  %1538 = vmatpush1.bf16.msra.mxu0 %v2046_v21  ;;  %v2057_v26 = vld [vmem:[#allocation14 + $0xb4] ss:$8 sps:$4 sm:$0xff]  }
 0x360   :  { %v909_v28 = vmul.f32 0.5, %v904_v25  ;;  %1577 = vst [vmem:[#allocation17 + $0x8] sm:$0xff] %v904_v25  ;;  %1539 = vmatprep.subr.bf16.mxu0 %v2051_v22  ;;  %v2052_v25 = vld [vmem:[#allocation14 + $0xa0] ss:$8 sps:$4 sm:$0xff]   ;;  %v2055_v27 = vld [vmem:[#allocation14 + $0xb0] ss:$8 sps:$4 sm:$0xff]  }
 0x362   :  { %v910_v29 = vmul.f32 1.442695, %v909_v28  ;;  %v2060_v28 = vld [vmem:[#allocation14 + $0xc4] ss:$8 sps:$4 sm:$0xff]  }
 0x364   :  { %2070 = vpow2.f32 %v910_v29  ;;  %v2058_v29 = vld [vmem:[#allocation14 + $0xc0] ss:$8 sps:$4 sm:$0xff]  }
 0x36e   :  { %v2071_v31 = vpop.eup %2070 }
 0x36f   :  { %v912_v32 = vmul.f32 %v2071_v31, %v908_v30  ;;  %v2063_v30 = vld [vmem:[#allocation14 + $0xd4] ss:$8 sps:$4 sm:$0xff]   ;;  %v2061_v31 = vld [vmem:[#allocation14 + $0xd0] ss:$8 sps:$4 sm:$0xff]  }
 0x371   :  { %v913_v34 = vadd.f32 %v912_v32, %v902_v23  ;;  %v2049_v23 = vld [vmem:[#allocation14 + $0x90] ss:$8 sps:$4 sm:$0xff]  }
 0x372   :  { %1540 = vmatpush1.bf16.msra.mxu0 %v2049_v23  ;;  %v931_v32 = vld [vmem:[%s2594_s9] sm:$0x3] }
 0x373   :  { %v914_v37 = vpack.c.bf16 %v913_v34, %v913_v34  ;;  %1541 = vmatprep.subr.bf16.mxu0 %v2054_v24  ;;  %v936_v34 = vrot.slane %v931_v32, %v2527_v33 }
 0x375   :  { %1056 = vmatmul.mubr.bf16.vlgmr.msra.gmra.mrb[4].mxu1 %v914_v37 }
 0x376   :  { %1273 = vmatpush1.bf16.msra.mxu1 %v1974_v36  ;;  %1542 = vmatpush1.bf16.msra.mxu0 %v2052_v25  ;;  %v940_v36 = vrot.slane %v931_v32, %v2532_v35 }
 0x377   :  { %1274 = vmatprep.subr.bf16.mxu1 %v1979_v38  ;;  %1543 = vmatprep.subr.bf16.mxu0 %v2057_v26 }
 0x37a   :  { %1275 = vmatpush1.bf16.msra.mxu1 %v1977_v39  ;;  %1544 = vmatpush1.bf16.msra.mxu0 %v2055_v27 }
 0x37b   :  { %1276 = vmatprep.subr.bf16.mxu1 %v1982_v40  ;;  %1545 = vmatprep.subr.bf16.mxu0 %v2060_v28 }
 0x37e   :  { %1277 = vmatpush1.bf16.msra.mxu1 %v1980_v41  ;;  %1546 = vmatpush1.bf16.msra.mxu0 %v2058_v29 }
 0x37f   :  { %1278 = vmatprep.subr.bf16.mxu1 %v1985_v42  ;;  %1547 = vmatprep.subr.bf16.mxu0 %v2063_v30 }
 0x382   :  { %1279 = vmatpush1.bf16.msra.mxu1 %v1983_v43  ;;  %1548 = vmatpush1.bf16.msra.mxu0 %v2061_v31 }
 0x383   :  { %1280 = vmatprep.subr.bf16.mxu1 %v1988_v44 }
 0x386   :  { %1281 = vmatpush1.bf16.msra.mxu1 %v1986_v45 }
 0x387   :  { %1282 = vmatprep.subr.bf16.mxu1 %v1991_v46 }
 0x38a   :  { %1283 = vmatpush1.bf16.msra.mxu1 %v1989_v47  ;;  %v2066_v47 = vld [vmem:[#allocation14 + $0xe4] ss:$8 sps:$4 sm:$0xff]  }
 0x38b   :  { %1284 = vmatprep.subr.bf16.mxu1 %v1994_v48  ;;  %v2064_v48 = vld [vmem:[#allocation14 + $0xe0] ss:$8 sps:$4 sm:$0xff]   ;;  %1549 = vmatprep.subr.bf16.mxu0 %v2066_v47 }
 0x38c   :  { %1550 = vmatpush1.bf16.msra.mxu0 %v2064_v48 }
 0x38e   :  { %1285 = vmatpush1.bf16.msra.mxu1 %v1992_v49  ;;  %v2069_v49 = vld [vmem:[#allocation14 + $0xf4] ss:$8 sps:$4 sm:$0xff]  }
 0x38f   :  { %1286 = vmatprep.subr.bf16.mxu1 %v1997_v50  ;;  %v2067_v50 = vld [vmem:[#allocation14 + $0xf0] ss:$8 sps:$4 sm:$0xff]   ;;  %1551 = vmatprep.subr.bf16.mxu0 %v2069_v49 }
 0x390   :  { %1552 = vmatpush1.bf16.msra.mxu0 %v2067_v50 }
 0x392   :  { %1287 = vmatpush1.bf16.msra.mxu1 %v1995_v51  ;;  %v1100_v51 = vld [vmem:[%s2596_s11] sm:$0x3]  ;;  %s2256_s11 = scalar_lea.vmem %s1595_s18, 256 }
 0x393   :  { %1288 = vmatprep.subr.bf16.mxu1 %v2000_v52  ;;  %v1105_v52 = vrot.slane %v1100_v51, %v2527_v33  ;;  %p2257_p8 = scmp.ne.s32.totalorder %s1595_s18, %s2256_s11  ;;  %p2262_p10 = scmp.lt.s32.totalorder %s2256_s11, %s2256_s11 }
 0x395   :  { %p2263_p11 = por %p2262_p10, %p2261_p9 }
 0x396   :  { %1289 = vmatpush1.bf16.msra.mxu1 %v1998_v53  ;;  %v1109_v53 = vrot.slane %v1100_v51, %v2532_v35 }
 0x397   :  { %1290 = vmatprep.subr.bf16.mxu1 %v2003_v54  ;;  %p2264_p12 = pnand %p2263_p11, %p2257_p8 }
 0x39a   :  { %1291 = vmatpush1.bf16.msra.mxu1 %v2001_v55 }
 0x39b   :  { %1292 = vmatprep.subr.bf16.mxu1 %v2006_v56 }
 0x39e   :  { %1293 = vmatpush1.bf16.msra.mxu1 %v2004_v57 }
 0x39f   :  { %1294 = vmatprep.subr.bf16.mxu1 %v2009_v58 }
 0x3a2   :  { %1295 = vmatpush1.bf16.msra.mxu1 %v2007_v59 }
 0x3a3   :  { %1296 = vmatprep.subr.bf16.mxu1 %v2012_v60 }
 0x3a6   :  { %1297 = vmatpush1.bf16.msra.mxu1 %v2010_v61 }
 0x3a7   :  { %1298 = vmatprep.subr.bf16.mxu1 %v2015_v62 }
 0x3aa   :  { %1299 = vmatpush1.bf16.msra.mxu1 %v2013_v63 }
 0x3ab   :  { %1300 = vmatprep.subr.bf16.mxu1 %v2018_v0 }
 0x3ae   :  { %1301 = vmatpush1.bf16.msra.mxu1 %v2016_v1 }
 0x3af   :  { %1302 = vmatprep.subr.bf16.mxu1 %v2021_v2 }
 0x3b2   :  { %1303 = vmatpush1.bf16.msra.mxu1 %v2019_v3 }
 0x448   :  { %v1057_v37 = vpop.f32.mrb[4].mxu1 }
 0x449   :  { %v1058_v38 = vadd.f32 %v1057_v37, %v936_v34  ;;  %v1059_v39 = vpop.f32.mrb[5].mxu1 }
 0x44a   :  { %v1060_v40 = vadd.f32 %v1059_v39, %v940_v36  ;;  %v1061_v41 = vpop.f32.mrb[6].mxu1 }
 0x44b   :  { %v1064_v42 = vmax.f32 %v1058_v38, 0.0  ;;  %v1062_v43 = vpop.f32.mrb[7].mxu1 }
 0x44c   :  { %v1065_v44 = vmax.f32 %v1060_v40, 0.0 }
 0x44d   :  { %v1066_v46 = vpack.c.bf16 %v1064_v42, %v1064_v42 }
 0x44e   :  { %v1067_v45 = vpack.c.bf16 %v1065_v44, %v1065_v44 }
 0x450   :  { %1304 = vmatprep.mubr.bf16.mxu1 %v1067_v45 }
 0x451   :  { %1305 = vmatmul.mubr.bf16.vlgmr.msra.gmra.mrb[8].mxu1 %v1066_v46 }
 0x524   :  { %v1306_v54 = vpop.f32.mrb[8].mxu1 }
 0x525   :  { %v1307_v55 = vadd.f32 %v1306_v54, %v1105_v52  ;;  %v1308_v56 = vpop.f32.mrb[9].mxu1 }
 0x526   :  { %v1309_v57 = vadd.f32 %v1308_v56, %v1109_v53  ;;  %v1310_v58 = vpop.f32.mrb[10].mxu1 }
 0x527   :  { %v1313_v59 = vmax.f32 %v1307_v55, 0.0  ;;  %v1311_v60 = vpop.f32.mrb[11].mxu1 }
 0x528   :  { %v1314_v61 = vmax.f32 %v1309_v57, 0.0 }
 0x529   :  { %v1315_v63 = vpack.c.bf16 %v1313_v59, %v1313_v59 }
 0x52a   :  { %v1316_v62 = vpack.c.bf16 %v1314_v61, %v1314_v61 }
 0x52c   :  { %1553 = vmatprep.mubr.bf16.mxu0 %v1316_v62 }
 0x52d   :  { %1554 = vmatmul.mubr.bf16.vlgmr.msra.gmra.mrb[8].mxu0 %v1315_v63 }
 0x52e   :  { %2267 = shalt.err (!%p2264_p12)
}
 0x52f   :  { %s2268_s23 = scalar_lea.hbm %s2600_s15, 256 }
 0x530   :  { %p2269_p13 = scmp.ne.s32.totalorder %s2600_s15, %s2268_s23  ;;  %p2272_p0 = scmp.lt.u32.totalorder %s2268_s23, %s2600_s15 }
 0x532   :  { %p2274_p1 = pnand %p2272_p0, %p2269_p13 }
 0x534   :  { %2277 = shalt.err (!%p2274_p1)
}
 0x535   :  { %1597 = dma.vmem_to_hbm [thread:$0]  %s1595_s18, 256, %s2600_s15, [#allocation18]   ;;  %v1349_v0 = vld [vmem:[%s2598_s13] sm:$0x3] }
 0x536   :  { %v1354_v1 = vrot.slane %v1349_v0, %v2527_v33  ;;  %v1358_v2 = vrot.slane %v1349_v0, %v2532_v35  ;;  %s2326_s13 = smov [#allocation16]  }
 0x537   :  { %s1584_s15 = sshll.u32 %s2326_s13, 4  ;;  %s1585_s15 = int_to_ptr.vmem [resolvable:$true] %s1584_s15 }
 0x538   :  { %s2278_s20 = scalar_lea.vmem %s1585_s15, 256  ;;  %p2283_p3 = scmp.lt.s32.totalorder %s1585_s15, %s1585_s15 }
 0x539   :  { %p2279_p2 = scmp.ne.s32.totalorder %s1585_s15, %s2278_s20  ;;  %p2284_p4 = scmp.lt.s32.totalorder %s2278_s20, %s2278_s20 }
 0x53b   :  { %p2285_p5 = por %p2284_p4, %p2283_p3 }
 0x53d   :  { %p2286_p6 = pnand %p2285_p5, %p2279_p2 }
 0x600   :  { %v1555_v3 = vpop.f32.mrb[8].mxu0 }
 0x601   :  { %v1556_v4 = vadd.f32 %v1555_v3, %v1354_v1  ;;  %v1557_v5 = vpop.f32.mrb[9].mxu0 }
 0x602   :  { %v1558_v6 = vadd.f32 %v1557_v5, %v1358_v2  ;;  %v1559_v7 = vpop.f32.mrb[10].mxu0 }
 0x603   :  { %v1789_v8 = vmul.f32 -1.442695, %v1556_v4  ;;  %v1560_v9 = vpop.f32.mrb[11].mxu0 }
 0x604   :  { %v1790_v10 = vmul.f32 -1.442695, %v1558_v6 }
 0x605   :  { %2072 = vpow2.f32 %v1789_v8 }
 0x606   :  { %2074 = vpow2.f32 %v1790_v10 }
 0x60f   :  { %v2073_v11 = vpop.eup %2072 }
 0x610   :  { %v2075_v12 = vpop.eup %2074  ;;  %v1568_v13 = vadd.f32 1.0, %v2073_v11 }
 0x611   :  { %v1569_v14 = vadd.f32 1.0, %v2075_v12 }
 0x612   :  { %2076 = vrcp.f32 %v1568_v13 }
 0x613   :  { %2078 = vrcp.f32 %v1569_v14 }
 0x61c   :  { %v2077_v33 = vpop.eup %2076 }
 0x61d   :  { %v2079_v35 = vpop.eup %2078  ;;  %1574 = vst [vmem:[#allocation16] sm:$0xff] %v2077_v33 }
 0x61e   :  { %1575 = vst [vmem:[#allocation16 + $0x8] sm:$0xff] %v2079_v35 }
 0x61f   :  { %2289 = shalt.err (!%p2286_p6)
}
 0x620   :  { %s2290_s8 = scalar_lea.hbm %s2599_s14, 256 }
 0x621   :  { %p2291_p7 = scmp.ne.s32.totalorder %s2599_s14, %s2290_s8  ;;  %p2294_p8 = scmp.lt.u32.totalorder %s2290_s8, %s2599_s14 }
 0x623   :  { %p2296_p9 = pnand %p2294_p8, %p2291_p7 }
 0x625   :  { %2299 = shalt.err (!%p2296_p9)
}
 0x626   :  { %1587 = dma.vmem_to_hbm [thread:$0]  %s1585_s15, 256, %s2599_s14, [#allocation4]  }
 0x627   :  { %2310 = dma.done.wait [#allocation4], 256  }
 0x628   :  { %2311 = vsyncadd [#allocation4], 4294967040 }
 0x629   :  { %2312 = dma.done.wait [#allocation18], 256  }
 0x62a   :  { %2313 = vsyncadd [#allocation18], 4294967040 }
 0x62b   :  { %1604 = vsyncpa [#allocation3], 1 }
 0x62c   :  { %1605 = vsyncpa [#allocation6], 1 }
 0x62d   :  { %1606 = vsyncpa [#allocation9], 1 }
 0x62e   :  { %1607 = vsyncpa [#allocation12], 1 }
 0x62f   :  { %1608 = vsyncpa [#allocation15], 1 }
 0x630   :  { %1609 = vsyncpa [#allocation4], 1 }
 0x631   :  { %1610 = vsyncpa [#allocation18], 1 }

</bundles_post_ra>
